<compile_context>
chip_gen: v7x
topology: tpu7x:2x2x1
jax: 0.10.0
libtpu: 0.0.40
codegen_flags: <defaults>
</compile_context>

<pallas_src>
import functools

import jax
import jax.numpy as jnp
from jax import lax
from jax.experimental import pallas as pl
from jax.experimental.pallas import tpu as pltpu


def _round_up(x: int, m: int) -> int:
    return (x + m - 1) // m * m


def _causal_delayline_kernel(to_tbl, ti_tbl, x_ref, w_ref, b_ref, *rest,
                             skip_connection):
    # to_tbl/ti_tbl: (n_blocks,) SMEM -- (output-time, input-time) tile ids
    # x_ref : (Sb, B, tt)  input slab at input-time tile `ti` (contraction)
    # w_ref : (Sb, tt, tt) pre-masked, pre-transposed weight tile [s, u, t]
    # b_ref : (Sb, 1, tt)  bias at output-time tile `to`
    # xs_ref: (Sb, B, tt)  input slab at output-time tile `to` (only if skip)
    # o_ref : (Sb, B, tt)  output slab at output-time tile `to`
    # acc   : (Sb, B, tt)  f32 accumulator scratch
    if skip_connection:
        xs_ref, o_ref, acc_ref = rest
    else:
        xs_ref = None
        o_ref, acc_ref = rest

    j = pl.program_id(1)
    to = to_tbl[j]
    ti = ti_tbl[j]

    @pl.when(ti == 0)
    def _():
        acc_ref[...] = jnp.zeros_like(acc_ref)

    # All tiles are pre-masked and stored [s, u, t]: one clean batched
    # (B, u) @ (u, t) MXU pass per step, identical for diagonal and
    # off-diagonal tiles.  Both operands share the (possibly narrow) weight
    # dtype; accumulation stays f32.
    x = x_ref[...]
    w = w_ref[...]
    if x.dtype != w.dtype:
        x = x.astype(w.dtype)
    acc_ref[...] += jnp.einsum("sbu,sut->sbt", x, w,
                               preferred_element_type=jnp.float32)

    # The diagonal tile (ti == to) is always the last scheduled tile of its
    # output-time row: fuse bias (+ optional skip connection) and store.
    @pl.when(ti == to)
    def _():
        y = acc_ref[...] + b_ref[...].astype(jnp.float32)
        if skip_connection:
            y = y + xs_ref[...].astype(jnp.float32)
        o_ref[...] = y.astype(o_ref.dtype)


def _auto_states_per_block(n_states: int, tt: int, weight_bytes: int,
                           target_tile_bytes: int = 2 * 1024 * 1024) -> int:
    """Largest divisor of S whose weight tile stays <= ~2 MiB while keeping
    >= 2 blocks on the parallel axis (v7x megacore) whenever possible."""
    per_state = tt * tt * weight_bytes
    best = 1
    for cand in range(1, n_states + 1):
        if n_states % cand:
            continue
        if cand * per_state > target_tile_bytes:
            break
        if n_states == 1 or n_states // cand >= 2:
            best = cand
    return best


def causal_delayline_feedforward(x, weights, biases=None, *,
                                 skip_connection=False,
                                 time_tile=256,
                                 states_per_block=None,
                                 weight_dtype=None,
                                 vmem_limit_bytes=None):
    """x: (B, T, S); weights: (S, T, T); biases: (S, T) or None -> (B, T, S)."""
    B, T, S = x.shape
    assert weights.shape == (S, T, T)
    if biases is None:
        biases = jnp.zeros((S, T), weights.dtype)

    # ---- tile sizing (pad T up to a 128-aligned tile multiple) ------------
    T_pad = _round_up(T, 128)
    tt = _round_up(min(time_tile, T_pad), 128)
    while T_pad % tt:
        tt -= 128                     # terminates at 128, which divides T_pad
    nt = T_pad // tt

    w_store_dtype = weight_dtype if weight_dtype is not None else weights.dtype
    w_bytes = jnp.dtype(w_store_dtype).itemsize
    sb = (states_per_block if states_per_block is not None
          else _auto_states_per_block(S, tt, w_bytes))
    if S % sb != 0:
        sb = 1
    n_sblk = S // sb

    # ---- block-lower-triangular schedule (scalar-prefetched tables) -------
    to_ids, ti_ids = [], []
    for o_t in range(nt):
        for i_t in range(o_t + 1):
            to_ids.append(o_t)
            ti_ids.append(i_t)
    n_blocks = len(to_ids)
    to_tbl = jnp.asarray(to_ids, jnp.int32)
    ti_tbl = jnp.asarray(ti_ids, jnp.int32)

    # ---- one-time weight prep (weights are static parameters) -------------
    # Apply the causal mask once, pad, then pack ONLY the lower-triangular
    # (to, ti) tiles as contiguous blocks, pre-transposed to [s, u, t] so the
    # in-kernel contraction is the natural MXU orientation (no vxpose, long
    # contiguous DMA bursts, strictly-upper tiles never stored or streamed).
    mask = jnp.tril(jnp.ones((T, T), weights.dtype))
    wm = weights * mask                                            # [s, t, u]
    wm = jnp.pad(wm, ((0, 0), (0, T_pad - T), (0, T_pad - T)))
    wm = wm.reshape(S, nt, tt, nt, tt).transpose(0, 1, 3, 4, 2)    # [s,to,ti,u,t]
    w_packed = wm[:, to_tbl, ti_tbl].astype(w_store_dtype)         # (S,nb,tt,tt)
    # TODO(synk): int8 (v5e/v6e) / fp8 (v7x) weight streaming with per-row
    # dequant folded into the finalize would halve HBM traffic again.

    b_pad = jnp.pad(biases, ((0, 0), (0, T_pad - T))).reshape(S, 1, T_pad)

    # State-major, lane-dense activations (one XLA transpose; weights dominate
    # HBM traffic for realistic T >> B, and the skip-add is fused in-kernel).
    x_sbt = jnp.transpose(x, (2, 0, 1))                            # (S, B, T)
    x_sbt = jnp.pad(x_sbt, ((0, 0), (0, 0), (0, T_pad - T)))

    kernel = functools.partial(_causal_delayline_kernel,
                               skip_connection=skip_connection)

    in_specs = [
        # x at the input-time (contraction) tile
        pl.BlockSpec((sb, B, tt), lambda s, j, to, ti: (s, 0, ti[j])),
        # pre-packed weight tile j (contiguous, already masked + transposed)
        pl.BlockSpec((sb, None, tt, tt), lambda s, j, to, ti: (s, j, 0, 0)),
        # bias at the output-time tile (re-fetched only when `to` changes)
        pl.BlockSpec((sb, 1, tt), lambda s, j, to, ti: (s, 0, to[j])),
    ]
    args = [to_tbl, ti_tbl, x_sbt, w_packed, b_pad]
    if skip_connection:
        # x at the output-time tile, for the fused residual add (only DMA'd
        # when the skip connection is actually enabled).
        in_specs.append(pl.BlockSpec((sb, B, tt),
                                     lambda s, j, to, ti: (s, 0, to[j])))
        args.append(x_sbt)

    out_sbt = pl.pallas_call(
        kernel,
        out_shape=jax.ShapeDtypeStruct((S, B, T_pad), x.dtype),
        grid_spec=pltpu.PrefetchScalarGridSpec(
            num_scalar_prefetch=2,
            grid=(n_sblk, n_blocks),
            in_specs=in_specs,
            out_specs=pl.BlockSpec((sb, B, tt),
                                   lambda s, j, to, ti: (s, 0, to[j])),
            scratch_shapes=[pltpu.VMEM((sb, B, tt), jnp.float32)],
        ),
        compiler_params=pltpu.CompilerParams(
            dimension_semantics=("parallel", "arbitrary"),
            # Default tiles (<= ~2 MiB weight, double-buffered) fit every
            # generation's default scoped VMEM; expose an override for users
            # who want generation-specific sizing (v7x: 64 MiB physical).
            vmem_limit_bytes=vmem_limit_bytes,
        ),
    )(*args)

    return jnp.transpose(out_sbt[:, :, :T], (1, 2, 0))             # (B, T, S)


def init_params(key, n_time_steps, n_state_variables, bias=True):
    """Synthetic init mimicking nn.Linear's uniform(-k, k), k = 1/sqrt(in)."""
    kw, kb = jax.random.split(key)
    k = 1.0 / jnp.sqrt(jnp.float32(n_time_steps))
    weights = jax.random.uniform(
        kw, (n_state_variables, n_time_steps, n_time_steps),
        minval=-k, maxval=k, dtype=jnp.float32)
    if bias:
        biases = jax.random.uniform(
            kb, (n_state_variables, n_time_steps),
            minval=-k, maxval=k, dtype=jnp.float32)
    else:
        biases = jnp.zeros((n_state_variables, n_time_steps), jnp.float32)
    return weights, biases


def reference(x, weights, biases, *, skip_connection=False):
    """Pure-JAX reference of the PyTorch forward (highest matmul precision)."""
    B, T, S = x.shape
    mask = jnp.tril(jnp.ones((T, T), weights.dtype))
    outs = []
    for s in range(S):
        wm = weights[s] * mask
        y = jnp.matmul(x[:, :, s], wm.T, precision=lax.Precision.HIGHEST)
        outs.append(y + biases[s][None, :])
    out = jnp.stack(outs, axis=-1)
    if skip_connection:
        out = out + x
    return out


if __name__ == "__main__":
    key = jax.random.PRNGKey(0)
    k1, k2, k3, k4 = jax.random.split(key, 4)

    # Case 1: module-sized small shape (T=16 padded to a single 128 tile),
    # f32 weights, fused skip connection.
    B, T, S = 2, 16, 4
    x = jax.random.normal(k1, (B, T, S), jnp.float32)
    w, b = init_params(k2, T, S, bias=True)
    out = jax.block_until_ready(
        causal_delayline_feedforward(x, w, b, skip_connection=True))
    ref = reference(x, w, b, skip_connection=True)
    assert out.shape == (B, T, S)
    assert jnp.allclose(out, ref, atol=1e-4, rtol=1e-4), "case1 mismatch"

    # Case 2: T=512 -> tt=256, nt=2: exercises the packed block-lower-
    # triangular schedule (3 of 4 tiles stored/streamed) and the no-skip path
    # (no residual input is DMA'd at all).
    B, T, S = 2, 512, 4
    x = jax.random.normal(k3, (B, T, S), jnp.float32)
    w, b = init_params(k4, T, S, bias=True)
    out = jax.block_until_ready(
        causal_delayline_feedforward(x, w, b, skip_connection=False))
    ref = reference(x, w, b, skip_connection=False)
    assert jnp.allclose(out, ref, atol=1e-4, rtol=1e-4), "case2 mismatch"

    # Case 3: bf16 weight streaming -- both MXU operands bf16, f32 accumulate,
    # residual added from the original f32 activations.
    out_bf = jax.block_until_ready(causal_delayline_feedforward(
        x, w, b, skip_connection=True, weight_dtype=jnp.bfloat16))
    x_b = x.astype(jnp.bfloat16).astype(jnp.float32)
    w_b = w.astype(jnp.bfloat16).astype(jnp.float32)
    ref_bf = reference(x_b, w_b, b, skip_connection=False) + x
    assert jnp.allclose(out_bf, ref_bf, atol=2e-3, rtol=2e-3), "case3 mismatch"

    print("KERNEL_OK")
</pallas_src>

<mosaic_0001>
module attributes {stable_mosaic.version = 11 : i64} {
  func.func @_causal_delayline_kernel(%arg0: i32, %arg1: i32, %arg2: memref<1xi32, #tpu.memory_space<smem>>, %arg3: memref<1xi32, #tpu.memory_space<smem>>, %arg4: memref<2x2x128xf32, #tpu.memory_space<vmem>>, %arg5: memref<2x1x128x128xf32, #tpu.memory_space<vmem>>, %arg6: memref<2x1x128xf32, #tpu.memory_space<vmem>>, %arg7: memref<2x2x128xf32, #tpu.memory_space<vmem>>, %arg8: memref<2x2x128xf32, #tpu.memory_space<vmem>>, %arg9: memref<2x2x128xf32, #tpu.memory_space<vmem>>) attributes {dimension_semantics = [#tpu.dimension_semantics<parallel>, #tpu.dimension_semantics<arbitrary>], iteration_bounds = array<i64: 2, 1>, scalar_prefetch = 2 : i64, scratch_operands = 1 : i64, tpu.core_type = #tpu.core_type<tc>, window_params = [{transform_indices = @transform_0, window_bounds = array<i64: 2, 2, 128>}, {transform_indices = @transform_1, window_bounds = array<i64: 2, 1, 128, 128>}, {transform_indices = @transform_2, window_bounds = array<i64: 2, 1, 128>}, {transform_indices = @transform_3, window_bounds = array<i64: 2, 2, 128>}, {transform_indices = @transform_4, window_bounds = array<i64: 2, 2, 128>}]} {
    %0 = arith.index_cast %arg1 : i32 to index
    %1 = memref.load %arg2[%0] : memref<1xi32, #tpu.memory_space<smem>>
    %2 = arith.index_cast %arg1 : i32 to index
    %3 = memref.load %arg3[%2] : memref<1xi32, #tpu.memory_space<smem>>
    %c0_i32 = arith.constant 0 : i32
    %4 = arith.cmpi eq, %3, %c0_i32 : i32
    %5 = arith.extui %4 : i1 to i32
    %c0_i32_0 = arith.constant 0 : i32
    %6 = arith.cmpi ne, %5, %c0_i32_0 : i32
    scf.if %6 {
      %cst_14 = arith.constant 0.000000e+00 : f32
      %17 = vector.broadcast %cst_14 : f32 to vector<2x2x128xf32>
      %c0_15 = arith.constant 0 : index
      %c0_16 = arith.constant 0 : index
      %c0_17 = arith.constant 0 : index
      %18 = vector.load %arg9[%c0_15, %c0_16, %c0_17] : memref<2x2x128xf32, #tpu.memory_space<vmem>>, vector<2x2x128xf32>
      tpu.vector_store %arg9[%c0_15, %c0_16, %c0_17], %17 {strides = array<i32>} : memref<2x2x128xf32, #tpu.memory_space<vmem>>, vector<2x2x128xf32>,
    } else {
    }
    %c0 = arith.constant 0 : index
    %c0_1 = arith.constant 0 : index
    %c0_2 = arith.constant 0 : index
    %7 = vector.load %arg4[%c0, %c0_1, %c0_2] : memref<2x2x128xf32, #tpu.memory_space<vmem>>, vector<2x2x128xf32>
    %c0_3 = arith.constant 0 : index
    %c0_4 = arith.constant 0 : index
    %c0_5 = arith.constant 0 : index
    %c0_6 = arith.constant 0 : index
    %8 = vector.load %arg5[%c0_3, %c0_4, %c0_5, %c0_6] : memref<2x1x128x128xf32, #tpu.memory_space<vmem>>, vector<2x1x128x128xf32>
    %9 = vector.shape_cast %8 : vector<2x1x128x128xf32> to vector<2x128x128xf32>
    %c0_7 = arith.constant 0 : index
    %c0_8 = arith.constant 0 : index
    %c0_9 = arith.constant 0 : index
    %10 = vector.load %arg9[%c0_7, %c0_8, %c0_9] : memref<2x2x128xf32, #tpu.memory_space<vmem>>, vector<2x2x128xf32>
    "tpu.trace_start"() <{level = 10 : i32, message = "sbu,sut->sbt"}> : () -> ()
    %cst = arith.constant dense<0.000000e+00> : vector<2x2x128xf32>
    %11 = tpu.matmul %7, %9, %cst {dimension_numbers = #tpu.dot_dimension_numbers<[2], [1], [1], [2], [0, 0, 0, 1, 1, 2], [0], [0]>} : vector<2x2x128xf32>, vector<2x128x128xf32>, vector<2x2x128xf32> -> vector<2x2x128xf32>
    "tpu.trace_stop"() : () -> ()
    %12 = arith.addf %10, %11 : vector<2x2x128xf32>
    %c0_10 = arith.constant 0 : index
    %c0_11 = arith.constant 0 : index
    %c0_12 = arith.constant 0 : index
    %13 = vector.load %arg9[%c0_10, %c0_11, %c0_12] : memref<2x2x128xf32, #tpu.memory_space<vmem>>, vector<2x2x128xf32>
    tpu.vector_store %arg9[%c0_10, %c0_11, %c0_12], %12 {strides = array<i32>} : memref<2x2x128xf32, #tpu.memory_space<vmem>>, vector<2x2x128xf32>,
    %14 = arith.cmpi eq, %3, %1 : i32
    %15 = arith.extui %14 : i1 to i32
    %c0_i32_13 = arith.constant 0 : i32
    %16 = arith.cmpi ne, %15, %c0_i32_13 : i32
    scf.if %16 {
      %c0_14 = arith.constant 0 : index
      %c0_15 = arith.constant 0 : index
      %c0_16 = arith.constant 0 : index
      %17 = vector.load %arg9[%c0_14, %c0_15, %c0_16] : memref<2x2x128xf32, #tpu.memory_space<vmem>>, vector<2x2x128xf32>
      %c0_17 = arith.constant 0 : index
      %c0_18 = arith.constant 0 : index
      %c0_19 = arith.constant 0 : index
      %18 = vector.load %arg6[%c0_17, %c0_18, %c0_19] : memref<2x1x128xf32, #tpu.memory_space<vmem>>, vector<2x1x128xf32>
      %19 = vector.broadcast %18 : vector<2x1x128xf32> to vector<2x2x128xf32>
      %20 = arith.addf %17, %19 : vector<2x2x128xf32>
      %c0_20 = arith.constant 0 : index
      %c0_21 = arith.constant 0 : index
      %c0_22 = arith.constant 0 : index
      %21 = vector.load %arg7[%c0_20, %c0_21, %c0_22] : memref<2x2x128xf32, #tpu.memory_space<vmem>>, vector<2x2x128xf32>
      %22 = arith.addf %20, %21 : vector<2x2x128xf32>
      %c0_23 = arith.constant 0 : index
      %c0_24 = arith.constant 0 : index
      %c0_25 = arith.constant 0 : index
      %23 = vector.load %arg8[%c0_23, %c0_24, %c0_25] : memref<2x2x128xf32, #tpu.memory_space<vmem>>, vector<2x2x128xf32>
      tpu.vector_store %arg8[%c0_23, %c0_24, %c0_25], %22 {strides = array<i32>} : memref<2x2x128xf32, #tpu.memory_space<vmem>>, vector<2x2x128xf32>,
    } else {
    }
    return
  }
  func.func @transform_0(%arg0: i32, %arg1: i32, %arg2: memref<1xi32, #tpu.memory_space<smem>>, %arg3: memref<1xi32, #tpu.memory_space<smem>>) -> (i32, i32, i32) {
    %0 = arith.index_cast %arg1 : i32 to index
    %1 = memref.load %arg3[%0] : memref<1xi32, #tpu.memory_space<smem>>
    %c0_i32 = arith.constant 0 : i32
    %c0_i32_0 = arith.constant 0 : i32
    return %arg0, %c0_i32, %1 : i32, i32, i32
  }
  func.func @transform_1(%arg0: i32, %arg1: i32, %arg2: memref<1xi32, #tpu.memory_space<smem>>, %arg3: memref<1xi32, #tpu.memory_space<smem>>) -> (i32, i32, i32, i32) {
    %c0_i32 = arith.constant 0 : i32
    %c0_i32_0 = arith.constant 0 : i32
    %c0_i32_1 = arith.constant 0 : i32
    return %arg0, %arg1, %c0_i32, %c0_i32_0 : i32, i32, i32, i32
  }
  func.func @transform_2(%arg0: i32, %arg1: i32, %arg2: memref<1xi32, #tpu.memory_space<smem>>, %arg3: memref<1xi32, #tpu.memory_space<smem>>) -> (i32, i32, i32) {
    %0 = arith.index_cast %arg1 : i32 to index
    %1 = memref.load %arg2[%0] : memref<1xi32, #tpu.memory_space<smem>>
    %c0_i32 = arith.constant 0 : i32
    %c0_i32_0 = arith.constant 0 : i32
    return %arg0, %c0_i32, %1 : i32, i32, i32
  }
  func.func @transform_3(%arg0: i32, %arg1: i32, %arg2: memref<1xi32, #tpu.memory_space<smem>>, %arg3: memref<1xi32, #tpu.memory_space<smem>>) -> (i32, i32, i32) {
    %0 = arith.index_cast %arg1 : i32 to index
    %1 = memref.load %arg2[%0] : memref<1xi32, #tpu.memory_space<smem>>
    %c0_i32 = arith.constant 0 : i32
    %c0_i32_0 = arith.constant 0 : i32
    return %arg0, %c0_i32, %1 : i32, i32, i32
  }
  func.func @transform_4(%arg0: i32, %arg1: i32, %arg2: memref<1xi32, #tpu.memory_space<smem>>, %arg3: memref<1xi32, #tpu.memory_space<smem>>) -> (i32, i32, i32) {
    %0 = arith.index_cast %arg1 : i32 to index
    %1 = memref.load %arg2[%0] : memref<1xi32, #tpu.memory_space<smem>>
    %c0_i32 = arith.constant 0 : i32
    %c0_i32_0 = arith.constant 0 : i32
    return %arg0, %c0_i32, %1 : i32, i32, i32
  }
}

</mosaic_0001>

<bundles_post_ra>
// kernel: tpu_custom_call.1
= control target key start
LH: loop header
LB: loop body
LE: loop exit
PB: predicated region body
PF: predicated region fallthrough
CT: control target
= control target key end

     0   :  { %s1706_s0 = inlined_call_operand.<no memory space> [shape: s32[1], index: 0, kind: input, shape index: {}]   ;;  %s1707_s1 = inlined_call_operand.<no memory space> [shape: s32[1], index: 1, kind: input, shape index: {}]   ;;  %s1708_s2 = inlined_call_operand.hbm [shape: f32[4,2,128], index: 2, kind: input, shape index: {}]   ;;  %s1709_s3 = inlined_call_operand.hbm [shape: f32[4,1,128,128], index: 3, kind: input, shape index: {}]   ;;  %s1710_s4 = inlined_call_operand.vmem [shape: f32[4,1,128], index: 4, kind: input, shape index: {}]   ;;  %s1711_s5 = inlined_call_operand.vmem [shape: f32[4,2,128], index: 5, kind: input, shape index: {}]   ;;  %s1712_s6 = inlined_call_operand.hbm [shape: f32[4,2,128], index: 6, kind: output, shape index: {}]  }
   0x1   :  { %1723 = sst [smem:[#allocation19_spill]] %s1708_s2 }
   0x2   :  { %1724 = sst [smem:[#allocation20_spill]] %s1709_s3 }
   0x3   :  { %1725 = sst [smem:[#allocation21_spill]] %s1710_s4 }
   0x4   :  { %1726 = sst [smem:[#allocation22_spill]] %s1711_s5 }
   0x5   :  { %1727 = sst [smem:[#allocation23_spill]] %s1712_s6 }
   0x6   :  { %11 = sst [smem:[#allocation4]] %s1706_s0 }
   0x7   :  { %12 = sst [smem:[#allocation5]] %s1707_s1 }
   0x8   :  { %13 = vsyncpa [#allocation7], 0 }
   0x9   :  { %15 = vsyncpa [#allocation7 + $0x1], 0 }
   0xa   :  { %16 = vsyncpa [#allocation10], 0 }
   0xb   :  { %18 = vsyncpa [#allocation10 + $0x1], 0 }
   0xc   :  { %19 = vsyncpa [#allocation8], 0 }
   0xd   :  { %21 = vsyncpa [#allocation8 + $0x1], 0  ;;  %s1295_s25 = smov 0   ;;  %s1297_s26 = smov 0  }
   0xe   :  { %s1299_s27 = smov 0   ;;  %s1301_s28 = smov 0  }
   0xf   :  { %s1303_s29 = smov 0   ;;  %s1305_s0 = smov 0  }
  0x10   :  { %s1307_s30 = smov 0   ;;  %s1309_s1 = smov 0  }
  0x11   :  { %s1311_s7 = smov 0   ;;  %s1313_s8 = smov 0  }
  0x12   :  { %s1315_s9 = smov 0   ;;  %s1317_s10 = smov 0  }
  0x13 LB: > { %1728 = sst [smem:[#allocation15_spill]] %s1195_s25  ;;  %s739_s11 = sadd.s32 4294967295, %s1239_s10   ;;  %s1239_s10 = sphi %s1317_s10, %s27_s10   ;;  %s1235_s9 = sphi %s1315_s9, %s1762_s9   ;;  %s1231_s8 = sphi %s1313_s8, %s1761_s8   ;;  %s1227_s7 = sphi %s1311_s7, %s1771_s7   ;;  %s1223_s1 = sphi %s1309_s1, %s1770_s1   ;;  %s1219_s30 = sphi %s1307_s30, %s1769_s30   ;;  %s1215_s0 = sphi %s1305_s0, %s1768_s0   ;;  %s1211_s29 = sphi %s1303_s29, %s1767_s29   ;;  %s1207_s28 = sphi %s1301_s28, %s1766_s28   ;;  %s1203_s27 = sphi %s1299_s27, %s1765_s27   ;;  %s1199_s26 = sphi %s1297_s26, %s1764_s26   ;;  %s1195_s25 = sphi %s1295_s25, %s1763_s25  }
  0x14   : > { %1729 = sst [smem:[#allocation16_spill]] %s1235_s9  ;;  %s740_s12 = sadd.s32 4294967294, %s1239_s10  }
  0x15   : > { %s39_s13 = sadd.s32 1, %s1235_s9  ;;  %s43_s14 = sld [smem:[#allocation5]] }
  0x16   : > { %p41_p0 = scmp.ge.s32.totalorder %s39_s13, 2  ;;  %s50_s15 = sadd.s32 1, %s1227_s7 }
  0x17   : > { %p57_p1 = scmp.ne.s32.totalorder %s1227_s7, %s1223_s1  ;;  %p1716_p2 = scmp.eq.s32.totalorder %s1239_s10, 0 }
  0x18   : > { %s1773_s13 = smov (%p41_p0, %s39_s13), 0  ;;  %p63_p4 = scmp.ne.s32.totalorder %s1223_s1, %s1219_s30 }
  0x19   : > { %1730 = sst [smem:[#allocation17_spill]] %s1773_s13  ;;  %p1364_p3 = por %p1716_p2, %p57_p1 }
  0x1a   : > { %s45_s17 = ssub.s32 %s1235_s9, %s1773_s13  ;;  %p1371_p5 = scmp.eq.s32.totalorder %s739_s11, 0 }
  0x1b   : > { %p1375_p6 = scmp.eq.s32.totalorder %s45_s17, 0  ;;  %s168_s21 = sadd.s32 1, %s1203_s27 }
  0x1c   : > { %s1732_s18 = scalar_select %p1371_p5, 1, 0 }
  0x1d   : > { %p1381_p7 = por %p1371_p5, %p63_p4  ;;  %p178_p8 = scmp.ne.s32.totalorder %s1203_s27, %s1199_s26 }
  0x1e   : > { %s1391_s22 = scalar_select %p1375_p6, %s1227_s7, %s50_s15  }
  0x1f   : > { %s1734_s20 = scalar_select %p1381_p7, 1, 0 }
  0x20   : > { %1735 = sst [smem:[#allocation18_spill]] %s1391_s22  ;;  %p179_p9 = scmp.eq.s32.totalorder %s739_s11, 1 }
  0x21   : > { %p184_p10 = scmp.ne.s32.totalorder %s1199_s26, %s1195_s25  ;;  %p185_p11 = scmp.eq.s32.totalorder %s740_s12, 1 }
  0x22   : > { %p1396_p13 = por %p179_p9, %p178_p8  ;;  %p1717_p0 = scmp.lt.s32.totalorder %s1239_s10, 2 }
  0x23   : > { %p1401_p1 = por %p185_p11, %p184_p10  ;;  %s205_s30 = sand.u32 1, %s1227_s7  }
  0x24   : > { %s1736_s23 = scalar_select %p1396_p13, 1, 0 }
  0x25   : > { %s1737_s24 = scalar_select %p1401_p1, 1, 0 }
  0x26   : > { %s743_s15 = sshll.u32 %s205_s30, 2  ;;  %s744_s17 = sshll.u32 %s1235_s9, 1 }
  0x27   : > { %s1410_s11 = scalar_select %p1375_p6, %s1203_s27, %s168_s21  }
  0x28   : > { %s215_s13 = sadd.s32 %s744_s17, %s43_s14  ;;  %s209_s22 = scalar_lea.vmem [#allocation6], %s743_s15 }
  0x29   : > { %s745_s12 = sshll.u32 %s215_s13, 5  ;;  %s218_s25 = sshll.u32 %s209_s22, 4  ;;  %s1417_s25 = int_to_ptr.vmem [resolvable:$true] %s218_s25 }
  0x2a   : > { %s1738_s2 = sld [smem:[#allocation19_spill]]  ;;  %p1423_p4 = pnand %p1717_p0, %p1364_p3 }
  0x2b   : > { %s1429_s13 = scalar_lea.sflag [#allocation7], %s205_s30 }
  0x2c   : > { %p1047_p11 = pneg %p1423_p4 }
  0x30   : > { %s1415_s4 = scalar_lea.hbm %s1738_s2, %s745_s12  ;;  %s1050_s16 = scalar_lea.hbm %s1738_s2, 128 }
  0x31   : > { %s1045_s5 = scalar_lea.hbm %s1415_s4, 64  ;;  %p1051_p3 = scmp.lt.u32.totalorder %s1415_s4, %s1738_s2 }
  0x32   : > { %p1046_p10 = scmp.ne.s32.totalorder %s1415_s4, %s1045_s5  ;;  %p1052_p0 = scmp.lt.u32.totalorder %s1050_s16, %s1045_s5 }
  0x33   : > { %p1054_p9 = scmp.lt.u32.totalorder %s1045_s5, %s1415_s4 }
  0x34   : > { %p1048_p12 = pnand %p1047_p11, %p1046_p10  ;;  %p1053_p8 = por %p1052_p0, %p1051_p3 }
  0x36   : > { %p1049_p2 = pneg %p1048_p12  ;;  %p1055_p1 = por %p1054_p9, %p1053_p8 }
  0x38   : > { %p1056_p13 = pnand %p1055_p1, %p1049_p2 }
  0x3a   : > { %1059 = shalt.err (!%p1056_p13)
}
  0x3b   : > { %s1060_s30 = scalar_lea.vmem %s1417_s25, 64  ;;  %s1241_s17 = smov [#allocation6]  }
  0x3c   : > { %p1061_p12 = scmp.ne.s32.totalorder %s1417_s25, %s1060_s30  ;;  %s1065_s12 = sshll.u32 %s1241_s17, 4  ;;  %s1066_s12 = int_to_ptr.vmem [resolvable:$false] %s1065_s12 }
  0x3d   : > { %s1067_s6 = scalar_lea.vmem %s1066_s12, 128  ;;  %p1068_p5 = scmp.lt.s32.totalorder %s1417_s25, %s1066_s12 }
  0x3e   : > { %p1063_p10 = pnand %p1061_p12, %p1047_p11  ;;  %p1069_p0 = scmp.lt.s32.totalorder %s1067_s6, %s1060_s30 }
  0x40   : > { %p1064_p7 = pneg %p1063_p10  ;;  %p1070_p3 = por %p1069_p0, %p1068_p5 }
  0x42   : > { %p1071_p8 = pnand %p1070_p3, %p1064_p7 }
  0x44   : > { %1074 = shalt.err (!%p1071_p8)
}
  0x45   : > { %s1242_s5 = smov 32   ;;  %s1243_s14 = smov 2  }
  0x46   : > { %929 = dma.hbm_to_vmem [thread:$0]  (!%p1423_p4), %s1415_s4, 64, %s1417_s25, %s1429_s13, %s1242_s5, %s1242_s5, %s1243_s14  }
  0x47   : > { %p1740_p2 = scmp.lt.s32.totalorder %s1239_s10, 3  ;;  %p1741_p5 = scmp.ge.s32.totalorder %s1239_s10, 1 }
  0x48   : > { %s78_s22 = sadd.s32 1, %s1215_s0  ;;  %p85_p13 = scmp.ne.s32.totalorder %s1215_s0, %s1211_s29 }
  0x49   : > { %p1461_p7 = pnand %p1741_p5, %p1740_p2  ;;  %p91_p1 = scmp.ne.s32.totalorder %s1211_s29, %s1207_s28 }
  0x4a   : > { %s1469_s15 = scalar_select %p1375_p6, %s1215_s0, %s78_s22  }
  0x4b   : > { %s228_s30 = sand.u32 1, %s1215_s0   ;;  %s767_s17 = sshll.u32 %s1235_s9, 12 }
  0x4c   : > { %p1743_p9 = scmp.eq.s32.totalorder %s1239_s10, 0  ;;  %p1744_p12 = scmp.ne.s32.totalorder %s1732_s18, 0 }
  0x4d   : > { %s746_s4 = sshll.u32 %s228_s30, 8  ;;  %s1746_s3 = sld [smem:[#allocation20_spill]] }
  0x4e   : > { %p87_p11 = por %p85_p13, %p1743_p9  ;;  %p1481_p10 = por %p91_p1, %p1744_p12 }
  0x4f   : > { %s232_s28 = scalar_lea.vmem [#allocation9], %s746_s4  ;;  %p1747_p6 = scmp.lt.s32.totalorder %s1239_s10, 2 }
  0x50   : > { %s1745_s21 = scalar_select %p1481_p10, 1, 0 }
  0x51   : > { %s242_s19 = sshll.u32 %s232_s28, 4  ;;  %p1492_p4 = pnand %p1747_p6, %p87_p11  ;;  %s1496_s19 = int_to_ptr.vmem [resolvable:$true] %s242_s19 }
  0x52   : > { %s1498_s18 = scalar_lea.sflag [#allocation10], %s228_s30 }
  0x53   : > { %s1488_s12 = scalar_lea.hbm %s1746_s3, %s767_s17  ;;  %p1077_p3 = pneg %p1492_p4 }
  0x54   : > { %s1075_s5 = scalar_lea.hbm %s1488_s12, 4096  ;;  %s1080_s17 = scalar_lea.hbm %s1746_s3, 8192 }
  0x55   : > { %p1076_p0 = scmp.ne.s32.totalorder %s1488_s12, %s1075_s5  ;;  %p1081_p5 = scmp.lt.u32.totalorder %s1488_s12, %s1746_s3 }
  0x56   : > { %p1082_p13 = scmp.lt.u32.totalorder %s1080_s17, %s1075_s5  ;;  %p1084_p9 = scmp.lt.u32.totalorder %s1075_s5, %s1488_s12 }
  0x57   : > { %p1078_p8 = pnand %p1077_p3, %p1076_p0 }
  0x58   : > { %p1083_p1 = por %p1082_p13, %p1081_p5 }
  0x59   : > { %p1079_p2 = pneg %p1078_p8 }
  0x5a   : > { %p1085_p11 = por %p1084_p9, %p1083_p1 }
  0x5c   : > { %p1086_p12 = pnand %p1085_p11, %p1079_p2 }
  0x5e   : > { %1089 = shalt.err (!%p1086_p12)
}
  0x5f   : > { %s1090_s30 = scalar_lea.vmem %s1496_s19, 4096  ;;  %s1244_s13 = smov [#allocation9]  }
  0x60   : > { %p1091_p6 = scmp.ne.s32.totalorder %s1496_s19, %s1090_s30  ;;  %s1095_s28 = sshll.u32 %s1244_s13, 4  ;;  %s1096_s28 = int_to_ptr.vmem [resolvable:$false] %s1095_s28 }
  0x61   : > { %s1097_s14 = scalar_lea.vmem %s1096_s28, 8192  ;;  %p1098_p10 = scmp.lt.s32.totalorder %s1496_s19, %s1096_s28 }
  0x62   : > { %p1093_p0 = pnand %p1091_p6, %p1077_p3  ;;  %p1099_p5 = scmp.lt.s32.totalorder %s1097_s14, %s1090_s30 }
  0x64   : > { %p1094_p8 = pneg %p1093_p0  ;;  %p1100_p13 = por %p1099_p5, %p1098_p10 }
  0x66   : > { %p1101_p1 = pnand %p1100_p13, %p1094_p8 }
  0x68   : > { %1104 = shalt.err (!%p1101_p1)
}
  0x69   : > { %s1245_s5 = smov 128   ;;  %s1246_s22 = smov 8  }
  0x6a   : > { %932 = dma.hbm_to_vmem [thread:$0]  (!%p1492_p4), %s1488_s12, 4096, %s1496_s19, %s1498_s18, %s1245_s5, %s1245_s5, %s1246_s22  }
  0x6b   : > { %281 = sbr.rel (%p1461_p7) target bundleno = 426 (0x1aa), region = 36  ;;  %s283_s17 = sand.u32 (!%p1461_p7), 1, %s1223_s1  }
  0x6c   : > { %s1529_s4 = sshll.u32 (!%p1461_p7), %s283_s17, 2  ;;  %s284_s25 = scalar_lea.sflag (!%p1461_p7), [#allocation7], %s283_s17 }
  0x6d   : > { %p1749_p10 = scmp.ne.s32.totalorder (!%p1461_p7), %s1734_s20, 0 }
  0x72   : > { %1182 = dma.done.wait (%p1749_p10), %s284_s25, 64  }
  0x73   : > { %1184 = vsyncadd (%p1749_p10), %s284_s25, 4294967232  ;;  %s292_s6 = sand.u32 1, %s1211_s29   ;;  %p1750_p7 = scmp.ne.s32.totalorder %s1745_s21, 0 }
  0x74   : > { %s752_s12 = sshll.u32 %s292_s6, 8  ;;  %s293_s19 = scalar_lea.sflag [#allocation10], %s292_s6 }
  0x75   : > { %s1537_s16 = scalar_lea.vmem [#allocation9], %s752_s12 }
  0x76   : > { %1186 = dma.done.wait (%p1750_p7), %s293_s19, 4096  }
  0x77   : > { %1188 = vsyncadd (%p1750_p7), %s293_s19, 4294963200  ;;  %s1544_s18 = sshll.u32 %s1231_s8, 1  ;;  %s340_s20 = sand.u32 1, %s1199_s26  }
  0x78   : > { %s1547_s13 = sld [smem:[#allocation4]]  ;;  %p348_p4 = scmp.lt.s32.totalorder %s1544_s18, 3 }
  0x79   : > { %s1550_s28 = sld [smem:[#allocation5]]  ;;  %s753_s14 = sshll.u32 %s340_s20, 2 }
  0x7a   : > { %s349_s5 = scalar_select %p348_p4, %s1544_s18, 3 }
  0x7b   : > { %s1751_s8 = sld [smem:[#allocation21_spill]]  ;;  %s1752_s2 = sld [smem:[#allocation22_spill]] }
  0x7c   : > { %s1567_s9 = scalar_lea.vmem [#allocation11], %s753_s14 }
  0x7e   : > { %p350_p3 = scmp.lt.s32.totalorder %s1547_s13, 0 }
  0x7f   : > { %p757_p2 = scmp.ne.s32.totalorder %s1550_s28, 0 }
  0x80   : > { %s351_s21 = scalar_select %p350_p3, %s1547_s13, 0 }
  0x81   : > { %374 = sbr.rel (%p757_p2) target bundleno = 136 (0x88), region = 48  ;;  %v1247_v0 = vmov (!%p757_p2), 0.0  }
  0x82   : > { %s352_s22 = sadd.s32 %s351_s21, %s349_s5  ;;  %375 = vst [vmem:[#allocation2] sm:$0x3] (!%p757_p2), %v1247_v0  ;;  %376 = vst [vmem:[#allocation2 + $0x2] sm:$0x3] (!%p757_p2), %v1247_v0 }
  0x83   : > { %s1560_s6 = scalar_lea.vmem %s1751_s8, %s352_s22  ;;  %s756_s12 = sshll.u32 %s352_s22, 1 }
  0x84   : > { %s1565_s3 = scalar_lea.vmem %s1752_s2, %s756_s12 }
  0x88 PF: > { %v379_v1 = vld [vmem:[%s1537_s16] sm:$0xff]  ;;  %v380_v2 = vld [vmem:[%s1537_s16 + $0x8] sm:$0xff]  ;;  %v1248_v4 = vmov 0.0|0.0   ;;  %v381_v7 = vld [vmem:[%s1537_s16 + $0x10] sm:$0xff]  ;;  %vm1249_vm0 = vmmov 0   ;;  %v1250_v12 = vmov 0.0   ;;  %p758_p9 = scmp.ne.s32.totalorder %s1550_s28, %s1547_s13 }
  0x89   : > { %v395_v3 = vld [vmem:[%s1537_s16 + $0x80] sm:$0xff]  ;;  %872 = vmatprep.subr.bf16.mxu0 %v1248_v4  ;;  %896 = vmatprep.subr.bf16.mxu1 %v1248_v4  ;;  %v873_v5 = vpack.c.bf16 %v380_v2, %v379_v1  ;;  %v396_v6 = vld [vmem:[%s1537_s16 + $0x88] sm:$0xff]  ;;  %v382_v8 = vld [vmem:[%s1537_s16 + $0x18] sm:$0xff]  ;;  %s1753_s2 = scalar_lea.vmem [#allocation6], %s1529_s4 }
  0x8a   : > { %v897_v9 = vpack.c.bf16 %v396_v6, %v395_v3  ;;  %v397_v10 = vld [vmem:[%s1537_s16 + $0x90] sm:$0xff]  ;;  %v398_v11 = vld [vmem:[%s1537_s16 + $0x98] sm:$0xff]  ;;  %834 = vmatprep.mubr.msk.f32.mxu0 %vm1249_vm0, %v1250_v12  ;;  %869 = vmatprep.mubr.msk.f32.mxu1 %vm1249_vm0, %v1250_v12  ;;  %v876_v13 = vpack.c.bf16 %v382_v8, %v381_v7  ;;  %v383_v15 = vld [vmem:[%s1537_s16 + $0x20] sm:$0xff]  ;;  %s1754_s30 = smov %s1753_s2 }
  0x8b   : > { %874 = vmatpush3.bf16.msra.mxu0 %v873_v5  ;;  %v900_v14 = vpack.c.bf16 %v398_v11, %v397_v10  ;;  %v384_v16 = vld [vmem:[%s1537_s16 + $0x28] sm:$0xff]  ;;  %v399_v17 = vld [vmem:[%s1537_s16 + $0xa0] sm:$0xff]  ;;  %v385_v21 = vld [vmem:[%s1537_s16 + $0x30] sm:$0xff] }
  0x8c   : > { %898 = vmatpush3.bf16.msra.mxu1 %v897_v9  ;;  %875 = vmatprep.subr.bf16.mxu0 %v1248_v4  ;;  %v400_v18 = vld [vmem:[%s1537_s16 + $0xa8] sm:$0xff]  ;;  %v879_v19 = vpack.c.bf16 %v384_v16, %v383_v15  ;;  %v386_v22 = vld [vmem:[%s1537_s16 + $0x38] sm:$0xff]  ;;  %v401_v23 = vld [vmem:[%s1537_s16 + $0xb0] sm:$0xff] }
  0x8d   : > { %899 = vmatprep.subr.bf16.mxu1 %v1248_v4  ;;  %v903_v20 = vpack.c.bf16 %v400_v18, %v399_v17  ;;  %v402_v24 = vld [vmem:[%s1537_s16 + $0xb8] sm:$0xff]  ;;  %v882_v25 = vpack.c.bf16 %v386_v22, %v385_v21  ;;  %v387_v27 = vld [vmem:[%s1537_s16 + $0x40] sm:$0xff]  ;;  %v388_v28 = vld [vmem:[%s1537_s16 + $0x48] sm:$0xff] }
  0x8e   : > { %v906_v26 = vpack.c.bf16 %v402_v24, %v401_v23  ;;  %v403_v29 = vld [vmem:[%s1537_s16 + $0xc0] sm:$0xff]  ;;  %v404_v30 = vld [vmem:[%s1537_s16 + $0xc8] sm:$0xff]  ;;  %v885_v31 = vpack.c.bf16 %v388_v28, %v387_v27  ;;  %v389_v33 = vld [vmem:[%s1537_s16 + $0x50] sm:$0xff] }
  0x8f   : > { %877 = vmatpush3.bf16.msra.mxu0 %v876_v13  ;;  %v909_v32 = vpack.c.bf16 %v404_v30, %v403_v29  ;;  %v390_v34 = vld [vmem:[%s1537_s16 + $0x58] sm:$0xff]  ;;  %v405_v35 = vld [vmem:[%s1537_s16 + $0xd0] sm:$0xff]  ;;  %v391_v39 = vld [vmem:[%s1537_s16 + $0x60] sm:$0xff] }
  0x90   : > { %901 = vmatpush3.bf16.msra.mxu1 %v900_v14  ;;  %878 = vmatprep.subr.bf16.mxu0 %v1248_v4  ;;  %v406_v36 = vld [vmem:[%s1537_s16 + $0xd8] sm:$0xff]  ;;  %v888_v37 = vpack.c.bf16 %v390_v34, %v389_v33  ;;  %v392_v40 = vld [vmem:[%s1537_s16 + $0x68] sm:$0xff]  ;;  %v407_v41 = vld [vmem:[%s1537_s16 + $0xe0] sm:$0xff] }
  0x91   : > { %902 = vmatprep.subr.bf16.mxu1 %v1248_v4  ;;  %v912_v38 = vpack.c.bf16 %v406_v36, %v405_v35  ;;  %v408_v42 = vld [vmem:[%s1537_s16 + $0xe8] sm:$0xff]  ;;  %v891_v43 = vpack.c.bf16 %v392_v40, %v391_v39  ;;  %v393_v45 = vld [vmem:[%s1537_s16 + $0x70] sm:$0xff]  ;;  %v394_v46 = vld [vmem:[%s1537_s16 + $0x78] sm:$0xff] }
  0x92   : > { %v915_v44 = vpack.c.bf16 %v408_v42, %v407_v41  ;;  %v409_v47 = vld [vmem:[%s1537_s16 + $0xf0] sm:$0xff]  ;;  %v410_v48 = vld [vmem:[%s1537_s16 + $0xf8] sm:$0xff]  ;;  %v894_v49 = vpack.c.bf16 %v394_v46, %v393_v45 }
  0x93   : > { %880 = vmatpush3.bf16.msra.mxu0 %v879_v19  ;;  %v918_v50 = vpack.c.bf16 %v410_v48, %v409_v47  ;;  %v377_v51 = vld [vmem:[%s1753_s2] sm:$0x3]  ;;  %v378_v52 = vld [vmem:[%s1754_s30 + $0x2] sm:$0x3]  ;;  %v411_v53 = vld [vmem:[#allocation2] sm:$0x3] }
  0x94   : > { %904 = vmatpush3.bf16.msra.mxu1 %v903_v20  ;;  %881 = vmatprep.subr.bf16.mxu0 %v1248_v4  ;;  %v412_v54 = vld [vmem:[#allocation2 + $0x2] sm:$0x3]  ;;  %v759_v62 = vld [vmem:[%s1560_s6] ss:$0 sm:$0xff] (!%p758_p9)  ;;  %v760_v2 = vld [vmem:[%s1560_s6 + $0x1] ss:$0 sm:$0xff] (!%p758_p9) }
  0x95   : > { %905 = vmatprep.subr.bf16.mxu1 %v1248_v4  ;;  %v579_v63 = vld [vmem:[%s1565_s3] sm:$0x3] (!%p758_p9)  ;;  %v580_v3 = vld [vmem:[%s1565_s3 + $0x2] sm:$0x3] (!%p758_p9) }
  0x97   : > { %883 = vmatpush3.bf16.msra.mxu0 %v882_v25 }
  0x98   : > { %907 = vmatpush3.bf16.msra.mxu1 %v906_v26  ;;  %884 = vmatprep.subr.bf16.mxu0 %v1248_v4 }
  0x99   : > { %908 = vmatprep.subr.bf16.mxu1 %v1248_v4 }
  0x9b   : > { %886 = vmatpush3.bf16.msra.mxu0 %v885_v31 }
  0x9c   : > { %910 = vmatpush3.bf16.msra.mxu1 %v909_v32  ;;  %887 = vmatprep.subr.bf16.mxu0 %v1248_v4 }
  0x9d   : > { %911 = vmatprep.subr.bf16.mxu1 %v1248_v4 }
  0x9f   : > { %889 = vmatpush3.bf16.msra.mxu0 %v888_v37 }
  0xa0   : > { %913 = vmatpush3.bf16.msra.mxu1 %v912_v38  ;;  %890 = vmatprep.subr.bf16.mxu0 %v1248_v4 }
  0xa1   : > { %914 = vmatprep.subr.bf16.mxu1 %v1248_v4 }
  0xa3   : > { %892 = vmatpush3.bf16.msra.mxu0 %v891_v43 }
  0xa4   : > { %916 = vmatpush3.bf16.msra.mxu1 %v915_v44  ;;  %893 = vmatprep.subr.bf16.mxu0 %v1248_v4 }
  0xa5   : > { %917 = vmatprep.subr.bf16.mxu1 %v1248_v4 }
  0xa7   : > { %895 = vmatpush3.bf16.msra.mxu0 %v894_v49 }
  0xa8   : > { %919 = vmatpush3.bf16.msra.mxu1 %v918_v50 }
  0xaa   : > { %835 = vmatmul.mubr.f32.vlgmr.msra.gmra.mrb[0].mxu0 %v377_v51 }
  0xab   : > { %870 = vmatmul.mubr.f32.vlgmr.msra.gmra.mrb[0].mxu1 %v378_v52 }
 0x17b   : > { %560 = sbr.rel (%p758_p9) target bundleno = 398 (0x18e), region = 52 }
 0x17d   : > { %v479_v55 = vpop.f32.mrb[0].mxu0 }
 0x17e   : > { %v553_v56 = vadd.f32 %v479_v55, %v411_v53  ;;  %v549_v57 = vpop.f32.mrb[0].mxu1  ;;  %v836_v58 = vpop.f32.mrb[1].mxu0 }
 0x17f   : > { %v554_v59 = vadd.f32 %v549_v57, %v412_v54  ;;  %v871_v60 = vpop.f32.mrb[1].mxu1 }
 0x180   : > { %555 = vst [vmem:[#allocation2] sm:$0x3] %v553_v56 }
 0x181   : > { %556 = vst [vmem:[#allocation2 + $0x2] sm:$0x3] %v554_v59 }
 0x187   : > { %v561_v61 = vld [vmem:[#allocation2] sm:$0x3] }
 0x188   : > { %v577_v0 = vadd.f32 %v759_v62, %v561_v61  ;;  %v562_v1 = vld [vmem:[#allocation2 + $0x2] sm:$0x3] }
 0x189   : > { %v578_v4 = vadd.f32 %v760_v2, %v562_v1 }
 0x18a   : > { %v581_v5 = vadd.f32 %v579_v63, %v577_v0 }
 0x18b   : > { %v582_v6 = vadd.f32 %v580_v3, %v578_v4 }
 0x18c   : > { %583 = vst [vmem:[%s1567_s9] sm:$0x3] %v581_v5 }
 0x18d   : > { %584 = vst [vmem:[%s1567_s9 + $0x2] sm:$0x3] %v582_v6 }
 0x18e PF: > { %s593_s4 = sld [smem:[#allocation4]]  ;;  %s601_s16 = sshll.u32 %s1567_s9, 4  ;;  %s1631_s16 = int_to_ptr.vmem [resolvable:$true] %s601_s16 }
 0x18f   : > { %s1755_s5 = sld [smem:[#allocation23_spill]]  ;;  %s1641_s22 = scalar_lea.sflag [#allocation8], %s340_s20 }
 0x190   : > { %s1105_s17 = scalar_lea.vmem %s1631_s16, 64  ;;  %p1756_p12 = scmp.ne.s32.totalorder %s1736_s23, 0 }
 0x191   : > { %p1106_p11 = scmp.ne.s32.totalorder %s1631_s16, %s1105_s17  ;;  %s1251_s9 = smov [#allocation11]  }
 0x192   : > { %s1109_s25 = sshll.u32 %s1251_s9, 4  ;;  %s1110_s25 = int_to_ptr.vmem [resolvable:$false] %s1109_s25 }
 0x193   : > { %p1107_p6 = pnand %p1106_p11, %p1756_p12  ;;  %s1111_s8 = scalar_lea.vmem %s1110_s25, 128 }
 0x194   : > { %s598_s13 = sadd.s32 %s1544_s18, %s593_s4  ;;  %p1112_p8 = scmp.lt.s32.totalorder %s1631_s16, %s1110_s25 }
 0x195   : > { %s763_s28 = sshll.u32 %s598_s13, 5  ;;  %p1108_p0 = pneg %p1107_p6 }
 0x196   : > { %s1637_s21 = scalar_lea.hbm %s1755_s5, %s763_s28  ;;  %p1113_p5 = scmp.lt.s32.totalorder %s1111_s8, %s1105_s17 }
 0x198   : > { %p1114_p13 = por %p1113_p5, %p1112_p8 }
 0x19a   : > { %p1115_p1 = pnand %p1114_p13, %p1108_p0 }
 0x19c   : > { %1118 = shalt.err (!%p1115_p1)
}
 0x19d   : > { %s1119_s18 = scalar_lea.hbm %s1637_s21, 64  ;;  %s1123_s12 = scalar_lea.hbm %s1755_s5, 128 }
 0x19e   : > { %p1120_p10 = scmp.ne.s32.totalorder %s1637_s21, %s1119_s18  ;;  %p1124_p3 = scmp.lt.u32.totalorder %s1637_s21, %s1755_s5 }
 0x19f   : > { %p1125_p2 = scmp.lt.u32.totalorder %s1123_s12, %s1119_s18  ;;  %p1127_p11 = scmp.lt.u32.totalorder %s1119_s18, %s1637_s21 }
 0x1a0   : > { %p1121_p7 = pnand %p1120_p10, %p1756_p12 }
 0x1a1   : > { %p1126_p9 = por %p1125_p2, %p1124_p3 }
 0x1a2   : > { %p1122_p4 = pneg %p1121_p7 }
 0x1a3   : > { %p1128_p6 = por %p1127_p11, %p1126_p9 }
 0x1a5   : > { %p1129_p0 = pnand %p1128_p6, %p1122_p4 }
 0x1a7   : > { %1132 = shalt.err (!%p1129_p0)
}
 0x1a8   : > { %s1252_s30 = smov 32   ;;  %s1253_s4 = smov 2  }
 0x1a9   : > { %924 = dma.vmem_to_hbm [thread:$0]  (%p1756_p12), %s1631_s16, 64, %s1637_s21, %s1641_s22, %s1252_s30, %s1252_s30, %s1253_s4  }
 0x1aa PF: > { %s1757_s13 = sld [smem:[#allocation15_spill]]  ;;  %p1758_p8 = scmp.ne.s32.totalorder %s1737_s24, 0 }
 0x1ab   : > { %p1759_p5 = scmp.ge.s32.totalorder %s1239_s10, 2 }
 0x1ad   : > { %p934_p13 = pnand %p1759_p5, %p1758_p8 }
 0x1b0   : > { %s616_s28 = sand.u32 1, %s1757_s13  }
 0x1b1   : > { %s617_s3 = scalar_lea.sflag [#allocation8], %s616_s28 }
 0x1b2   : > { %1190 = dma.done.wait (!%p934_p13), %s617_s3, 64  }
 0x1b3   : > { %1192 = vsyncadd (!%p934_p13), %s617_s3, 4294967232  ;;  %s27_s10 = sadd.s32 1, %s1239_s10   ;;  %s1760_s23 = sld [smem:[#allocation18_spill]] }
 0x1b4   : > { %p24_p1 = scmp.ge.s32.totalorder %s27_s10, 4   ;;  %s1761_s8 = sld [smem:[#allocation16_spill]] }
 0x1b5   : > { %s1762_s9 = sld [smem:[#allocation17_spill]]  ;;  %s1763_s25 = smov %s1199_s26 }
 0x1b6   : > { %s1764_s26 = smov %s1203_s27  ;;  %s1765_s27 = smov %s1410_s11 }
 0x1b7   : > { %s1766_s28 = smov %s1211_s29  ;;  %s1767_s29 = smov %s1215_s0 }
 0x1b8   : > { %s1768_s0 = smov %s1469_s15  ;;  %s1769_s30 = smov %s1223_s1 }
 0x1b9   : > { %s1770_s1 = smov %s1227_s7  ;;  %s1771_s7 = smov %s1760_s23 }
 0x1ba   :  { %26 = sbr.rel (!%p24_p1) target bundleno = 19 (0x13), region = 108 }
 0x1c1   :  { %622 = vsyncpa [#allocation7], 1 }
 0x1c2   :  { %624 = vsyncpa [#allocation7 + $0x1], 1 }
 0x1c3   :  { %625 = vsyncpa [#allocation10], 1 }
 0x1c4   :  { %627 = vsyncpa [#allocation10 + $0x1], 1 }
 0x1c5   :  { %628 = vsyncpa [#allocation8], 1 }
 0x1c6   :  { %630 = vsyncpa [#allocation8 + $0x1], 1 }

</bundles_post_ra>
